<compile_context>
chip_gen: v6e
topology: v6e:2x2x1
jax: 0.10.0
libtpu: 0.0.40
codegen_flags: <defaults>
</compile_context>

<pallas_src>
import functools

import jax
import jax.numpy as jnp
from jax import lax
from jax.experimental import pallas as pl
from jax.experimental.pallas import tpu as pltpu


# ------------------------------- helpers ----------------------------------- #

def _round_up(x, m):
    return (x + m - 1) // m * m


def _pad2d(a, rows, cols):
    pr, pc = rows - a.shape[0], cols - a.shape[1]
    if pr or pc:
        a = jnp.pad(a, ((0, pr), (0, pc)))
    return a


def _pad_seq(a, t_new):
    # a: (H, T, D) -> pad T axis
    pt = t_new - a.shape[1]
    if pt:
        a = jnp.pad(a, ((0, 0), (0, pt), (0, 0)))
    return a


# ----------------------------- Pallas kernels ------------------------------ #

def _matmul_kernel(x_ref, w_ref, o_ref, acc_ref):
    @pl.when(pl.program_id(2) == 0)
    def _():
        acc_ref[...] = jnp.zeros_like(acc_ref)

    acc_ref[...] += jnp.dot(x_ref[...], w_ref[...],
                            preferred_element_type=jnp.float32)

    @pl.when(pl.program_id(2) == pl.num_programs(2) - 1)
    def _():
        o_ref[...] = acc_ref[...].astype(o_ref.dtype)


def _matmul_bias_kernel(x_ref, w_ref, b_ref, o_ref, acc_ref):
    @pl.when(pl.program_id(2) == 0)
    def _():
        acc_ref[...] = jnp.zeros_like(acc_ref)

    acc_ref[...] += jnp.dot(x_ref[...], w_ref[...],
                            preferred_element_type=jnp.float32)

    @pl.when(pl.program_id(2) == pl.num_programs(2) - 1)
    def _():
        o_ref[...] = (acc_ref[...] + b_ref[...].astype(jnp.float32)).astype(o_ref.dtype)


def _gate_up_silu_kernel(x_ref, wg_ref, wu_ref, o_ref, accg_ref, accu_ref):
    @pl.when(pl.program_id(2) == 0)
    def _():
        accg_ref[...] = jnp.zeros_like(accg_ref)
        accu_ref[...] = jnp.zeros_like(accu_ref)

    x = x_ref[...]
    accg_ref[...] += jnp.dot(x, wg_ref[...], preferred_element_type=jnp.float32)
    accu_ref[...] += jnp.dot(x, wu_ref[...], preferred_element_type=jnp.float32)

    @pl.when(pl.program_id(2) == pl.num_programs(2) - 1)
    def _():
        g = accg_ref[...]
        u = accu_ref[...]
        o_ref[...] = (g * jax.nn.sigmoid(g) * u).astype(o_ref.dtype)


def _rmsnorm_kernel(x_ref, w_ref, o_ref, *, eps):
    x = x_ref[...].astype(jnp.float32)
    var = jnp.mean(x * x, axis=-1, keepdims=True)
    o_ref[...] = (x * lax.rsqrt(var + eps)
                  * w_ref[...].astype(jnp.float32)).astype(o_ref.dtype)


def _add_rmsnorm_kernel(x_ref, r_ref, w_ref, y_ref, res_ref, *, eps):
    # residual stream kept in f32 to avoid drift across many layers
    z = x_ref[...].astype(jnp.float32) + r_ref[...]
    res_ref[...] = z
    var = jnp.mean(z * z, axis=-1, keepdims=True)
    y_ref[...] = (z * lax.rsqrt(var + eps)
                  * w_ref[...].astype(jnp.float32)).astype(y_ref.dtype)


def _flash_attn_kernel(q_ref, k_ref, v_ref, o_ref, m_ref, l_ref, acc_ref,
                       *, scale, tq, tkv):
    qi = pl.program_id(2)
    ki = pl.program_id(3)

    @pl.when(ki == 0)
    def _():
        m_ref[...] = jnp.full_like(m_ref, -jnp.inf)
        l_ref[...] = jnp.zeros_like(l_ref)
        acc_ref[...] = jnp.zeros_like(acc_ref)

    # Skip KV tiles that are entirely in the future of this query tile (causal).
    @pl.when(ki * tkv <= qi * tq + (tq - 1))
    def _():
        q = q_ref[0] * scale                                # bf16 (tq, D)
        k = k_ref[0]                                        # bf16 (tkv, D)
        s = lax.dot_general(q, k, dimension_numbers=(((1,), (1,)), ((), ())),
                            preferred_element_type=jnp.float32)   # (tq, tkv) f32
        row = qi * tq + lax.broadcasted_iota(jnp.int32, (tq, tkv), 0)
        col = ki * tkv + lax.broadcasted_iota(jnp.int32, (tq, tkv), 1)
        s = jnp.where(col <= row, s, -1e30)

        m_prev = m_ref[0]
        m_new = jnp.maximum(m_prev, s.max(-1, keepdims=True))
        alpha = jnp.exp(m_prev - m_new)
        p = jnp.exp(s - m_new)
        l_ref[0] = alpha * l_ref[0] + p.sum(-1, keepdims=True)
        acc_ref[0] = alpha * acc_ref[0] + jnp.dot(
            p.astype(v_ref.dtype), v_ref[0], preferred_element_type=jnp.float32)
        m_ref[0] = m_new

    @pl.when(ki == pl.num_programs(3) - 1)
    def _():
        o_ref[0] = (acc_ref[0]
                    * pl.reciprocal(l_ref[0], approx=True)).astype(o_ref.dtype)


# ----------------------------- kernel wrappers ------------------------------ #

def pallas_linear(x, w, b=None, *, tm=256, tk=512, tn=512):
    M, K = x.shape
    N = w.shape[1]
    tm = min(tm, _round_up(M, 8))
    tk = min(tk, _round_up(K, 128))
    tn = min(tn, _round_up(N, 128))
    Mp, Kp, Np = _round_up(M, tm), _round_up(K, tk), _round_up(N, tn)
    xp = _pad2d(x, Mp, Kp)
    wp = _pad2d(w, Kp, Np)
    grid = (Mp // tm, Np // tn, Kp // tk)
    cost = pl.CostEstimate(
        flops=2 * Mp * Kp * Np,
        transcendentals=0,
        bytes_accessed=int((Mp * Kp + Kp * Np + Mp * Np) * 2))
    common = dict(
        out_shape=jax.ShapeDtypeStruct((Mp, Np), x.dtype),
        grid=grid,
        out_specs=pl.BlockSpec((tm, tn), lambda i, j, k: (i, j)),
        scratch_shapes=[pltpu.VMEM((tm, tn), jnp.float32)],
        compiler_params=pltpu.CompilerParams(
            dimension_semantics=("parallel", "parallel", "arbitrary")),
        cost_estimate=cost,
    )
    if b is None:
        out = pl.pallas_call(
            _matmul_kernel,
            in_specs=[pl.BlockSpec((tm, tk), lambda i, j, k: (i, k)),
                      pl.BlockSpec((tk, tn), lambda i, j, k: (k, j))],
            **common)(xp, wp)
    else:
        bp = _pad2d(b.reshape(1, -1), 1, Np)
        out = pl.pallas_call(
            _matmul_bias_kernel,
            in_specs=[pl.BlockSpec((tm, tk), lambda i, j, k: (i, k)),
                      pl.BlockSpec((tk, tn), lambda i, j, k: (k, j)),
                      pl.BlockSpec((1, tn), lambda i, j, k: (0, j))],
            **common)(xp, wp, bp)
    return out[:M, :N]


def pallas_gate_up_silu(x, wg, wu, *, tm=256, tk=512, tn=512):
    """Fused gate_up projection + SiLU-and-mul epilogue (no T x 2I HBM round trip)."""
    M, K = x.shape
    N = wg.shape[1]
    tm = min(tm, _round_up(M, 8))
    tk = min(tk, _round_up(K, 128))
    tn = min(tn, _round_up(N, 128))
    Mp, Kp, Np = _round_up(M, tm), _round_up(K, tk), _round_up(N, tn)
    xp = _pad2d(x, Mp, Kp)
    wgp = _pad2d(wg, Kp, Np)
    wup = _pad2d(wu, Kp, Np)
    out = pl.pallas_call(
        _gate_up_silu_kernel,
        grid=(Mp // tm, Np // tn, Kp // tk),
        in_specs=[pl.BlockSpec((tm, tk), lambda i, j, k: (i, k)),
                  pl.BlockSpec((tk, tn), lambda i, j, k: (k, j)),
                  pl.BlockSpec((tk, tn), lambda i, j, k: (k, j))],
        out_specs=pl.BlockSpec((tm, tn), lambda i, j, k: (i, j)),
        out_shape=jax.ShapeDtypeStruct((Mp, Np), x.dtype),
        scratch_shapes=[pltpu.VMEM((tm, tn), jnp.float32),
                        pltpu.VMEM((tm, tn), jnp.float32)],
        compiler_params=pltpu.CompilerParams(
            dimension_semantics=("parallel", "parallel", "arbitrary")),
        cost_estimate=pl.CostEstimate(
            flops=4 * Mp * Kp * Np,
            transcendentals=Mp * Np,
            bytes_accessed=int((Mp * Kp + 2 * Kp * Np + Mp * Np) * 2)),
    )(xp, wgp, wup)
    return out[:M, :N]


def pallas_rmsnorm(x, w, eps, *, tm=256):
    T, H = x.shape
    tm = min(tm, _round_up(T, 8))
    Tp = _round_up(T, tm)
    xp = _pad2d(x, Tp, H)
    out = pl.pallas_call(
        functools.partial(_rmsnorm_kernel, eps=eps),
        grid=(Tp // tm,),
        in_specs=[pl.BlockSpec((tm, H), lambda i: (i, 0)),
                  pl.BlockSpec((1, H), lambda i: (0, 0))],
        out_specs=pl.BlockSpec((tm, H), lambda i: (i, 0)),
        out_shape=jax.ShapeDtypeStruct((Tp, H), x.dtype),
        compiler_params=pltpu.CompilerParams(dimension_semantics=("parallel",)),
    )(xp, w.reshape(1, H))
    return out[:T]


def pallas_add_rmsnorm(x, residual, w, eps, *, tm=256):
    T, H = x.shape
    tm = min(tm, _round_up(T, 8))
    Tp = _round_up(T, tm)
    xp = _pad2d(x, Tp, H)
    rp = _pad2d(residual, Tp, H)
    y, res = pl.pallas_call(
        functools.partial(_add_rmsnorm_kernel, eps=eps),
        grid=(Tp // tm,),
        in_specs=[pl.BlockSpec((tm, H), lambda i: (i, 0)),
                  pl.BlockSpec((tm, H), lambda i: (i, 0)),
                  pl.BlockSpec((1, H), lambda i: (0, 0))],
        out_specs=(pl.BlockSpec((tm, H), lambda i: (i, 0)),
                   pl.BlockSpec((tm, H), lambda i: (i, 0))),
        out_shape=(jax.ShapeDtypeStruct((Tp, H), x.dtype),
                   jax.ShapeDtypeStruct((Tp, H), jnp.float32)),
        compiler_params=pltpu.CompilerParams(dimension_semantics=("parallel",)),
    )(xp, rp, w.reshape(1, H))
    return y[:T], res[:T]


def pallas_flash_attention(q, k, v, scale, *, tile=256):
    # q: (H, T, D); k, v: (KVH, T, D) -- grouped-query causal attention (prefill)
    H, T, D = q.shape
    KVH = k.shape[0]
    group = H // KVH
    t = min(tile, _round_up(T, 8))
    Tp = _round_up(T, t)
    qp = _pad_seq(q, Tp)
    kp = _pad_seq(k, Tp)
    vp = _pad_seq(v, Tp)
    n_tiles = Tp // t
    out = pl.pallas_call(
        functools.partial(_flash_attn_kernel, scale=scale, tq=t, tkv=t),
        grid=(KVH, group, n_tiles, n_tiles),
        in_specs=[
            pl.BlockSpec((1, t, D), lambda kv, g, qi, ki: (kv * group + g, qi, 0)),
            pl.BlockSpec((1, t, D), lambda kv, g, qi, ki: (kv, ki, 0)),
            pl.BlockSpec((1, t, D), lambda kv, g, qi, ki: (kv, ki, 0)),
        ],
        out_specs=pl.BlockSpec((1, t, D), lambda kv, g, qi, ki: (kv * group + g, qi, 0)),
        out_shape=jax.ShapeDtypeStruct((H, Tp, D), q.dtype),
        scratch_shapes=[pltpu.VMEM((1, t, 1), jnp.float32),
                        pltpu.VMEM((1, t, 1), jnp.float32),
                        pltpu.VMEM((1, t, D), jnp.float32)],
        compiler_params=pltpu.CompilerParams(
            dimension_semantics=("parallel", "parallel", "parallel", "arbitrary")),
        cost_estimate=pl.CostEstimate(
            flops=4 * H * Tp * Tp * D,
            transcendentals=H * Tp * Tp,
            bytes_accessed=int((2 * H + 2 * KVH) * Tp * D * 2)),
    )(qp, kp, vp)
    return out[:, :T, :]


# ----------------------------- JAX glue (model) ----------------------------- #

def rope_cos_sin(positions, head_dim, theta):
    inv_freq = 1.0 / (theta ** (jnp.arange(0, head_dim, 2, dtype=jnp.float32)
                                / head_dim))
    freqs = positions.astype(jnp.float32)[:, None] * inv_freq[None, :]   # (T, D/2)
    return jnp.cos(freqs), jnp.sin(freqs)


def apply_rope(x, cos, sin):
    # x: (T, H, D), neox-style rotate-halves as in vLLM's get_rope.
    xf = x.astype(jnp.float32)
    x1, x2 = jnp.split(xf, 2, axis=-1)
    c = cos[:, None, :]
    s = sin[:, None, :]
    o1 = x1 * c - x2 * s
    o2 = x2 * c + x1 * s
    return jnp.concatenate([o1, o2], axis=-1).astype(x.dtype)


def decoder_layer(lp, cos, sin, hidden_states, residual, cfg):
    # input_layernorm (first layer: residual is None -> plain RMSNorm)
    if residual is None:
        residual = hidden_states.astype(jnp.float32)
        hidden_states = pallas_rmsnorm(hidden_states, lp["input_ln"], cfg["eps"])
    else:
        hidden_states, residual = pallas_add_rmsnorm(
            hidden_states, residual, lp["input_ln"], cfg["eps"])

    # --- self attention ---
    T = hidden_states.shape[0]
    qkv = pallas_linear(hidden_states, lp["qkv_w"], lp["qkv_b"])
    q, k, v = jnp.split(
        qkv, [cfg["q_size"], cfg["q_size"] + cfg["kv_size"]], axis=-1)
    q = q.reshape(T, cfg["num_heads"], cfg["head_dim"])
    k = k.reshape(T, cfg["num_kv_heads"], cfg["head_dim"])
    v = v.reshape(T, cfg["num_kv_heads"], cfg["head_dim"])
    q = apply_rope(q, cos, sin)
    k = apply_rope(k, cos, sin)

    attn = pallas_flash_attention(
        q.transpose(1, 0, 2), k.transpose(1, 0, 2), v.transpose(1, 0, 2),
        cfg["scaling"])
    attn = attn.transpose(1, 0, 2).reshape(T, cfg["num_heads"] * cfg["head_dim"])
    hidden_states = pallas_linear(attn, lp["o_w"])

    # post_attention_layernorm (fused residual add, residual stays f32)
    hidden_states, residual = pallas_add_rmsnorm(
        hidden_states, residual, lp["post_ln"], cfg["eps"])

    # --- MLP: fused gate_up + SiLU-and-mul, then down ---
    act = pallas_gate_up_silu(hidden_states, lp["gate_w"], lp["up_w"])
    hidden_states = pallas_linear(act, lp["down_w"])
    return hidden_states, residual


def qwen2_forward(params, input_ids, positions, cfg):
    # embed_tokens (gather kept in plain JAX glue)
    hidden_states = jnp.take(params["embed"], input_ids, axis=0)
    cos, sin = rope_cos_sin(positions, cfg["head_dim"], cfg["rope_theta"])
    residual = None
    for lp in params["layers"]:
        hidden_states, residual = decoder_layer(
            lp, cos, sin, hidden_states, residual, cfg)
    hidden_states, _ = pallas_add_rmsnorm(
        hidden_states, residual, params["norm"], cfg["eps"])
    return hidden_states


# ----------------------------- parameter init ------------------------------- #

def init_params(key, cfg):
    H = cfg["hidden_size"]
    I = cfg["intermediate_size"]
    q_size = cfg["q_size"]
    kv_size = cfg["kv_size"]
    qkv_out = q_size + 2 * kv_size
    dtype = jnp.bfloat16

    def nrm(k, shape, scale=0.02):
        return (scale * jax.random.normal(k, shape, dtype=jnp.float32)).astype(dtype)

    keys = jax.random.split(key, 1 + cfg["num_layers"])
    params = {
        "embed": nrm(keys[0], (cfg["vocab_size"], H)),
        "norm": jnp.ones((H,), jnp.float32),
        "layers": [],
    }
    for li in range(cfg["num_layers"]):
        lk = jax.random.split(keys[1 + li], 7)
        params["layers"].append({
            "input_ln": jnp.ones((H,), jnp.float32),
            "post_ln": jnp.ones((H,), jnp.float32),
            # weights stored (in, out) so kernels compute x @ W directly
            "qkv_w": nrm(lk[0], (H, qkv_out)),
            "qkv_b": nrm(lk[1], (qkv_out,)),
            "o_w": nrm(lk[2], (cfg["num_heads"] * cfg["head_dim"], H)),
            "gate_w": nrm(lk[3], (H, I)),
            "up_w": nrm(lk[4], (H, I)),
            "down_w": nrm(lk[5], (I, H)),
        })
    return params


# --------------------------------- main ------------------------------------- #

if __name__ == "__main__":
    # Small Qwen2-style config (TPU-friendly small shapes)
    hidden_size = 256
    num_heads = 4
    num_kv_heads = 2
    head_dim = hidden_size // num_heads
    cfg = {
        "vocab_size": 512,
        "hidden_size": hidden_size,
        "intermediate_size": 512,
        "num_layers": 2,
        "num_heads": num_heads,
        "num_kv_heads": num_kv_heads,
        "head_dim": head_dim,
        "q_size": num_heads * head_dim,
        "kv_size": num_kv_heads * head_dim,
        "scaling": head_dim ** -0.5,
        "rope_theta": 1000000.0,
        "eps": 1e-6,
    }

    key = jax.random.PRNGKey(0)
    pkey, ikey = jax.random.split(key)
    params = init_params(pkey, cfg)

    num_tokens = 128  # vLLM-style flattened token axis (prefill)
    input_ids = jax.random.randint(ikey, (num_tokens,), 0, cfg["vocab_size"],
                                   dtype=jnp.int32)
    positions = jnp.arange(num_tokens, dtype=jnp.int32)

    # TODO(synk): PagedAttention's paged KV-cache read/write (kv_caches /
    # InputMetadata) is not modeled; this runs the prefill path (causal
    # self-attention over the current tokens only).
    out = qwen2_forward(params, input_ids, positions, cfg)
    out = jax.block_until_ready(out)
    assert out.shape == (num_tokens, hidden_size)
    print("KERNEL_OK")
</pallas_src>

<mosaic_0001>
module attributes {stable_mosaic.version = 11 : i64} {
  func.func @_rmsnorm_kernel(%arg0: i32, %arg1: memref<128x256xbf16, #tpu.memory_space<vmem>>, %arg2: memref<1x256xf32, #tpu.memory_space<vmem>>, %arg3: memref<128x256xbf16, #tpu.memory_space<vmem>>) attributes {dimension_semantics = [#tpu.dimension_semantics<parallel>], iteration_bounds = array<i64: 1>, scalar_prefetch = 0 : i64, scratch_operands = 0 : i64, tpu.core_type = #tpu.core_type<tc>, window_params = [{transform_indices = @transform_0, window_bounds = array<i64: 128, 256>}, {pipeline_mode = #tpu.pipeline_mode<synchronous>, transform_indices = @transform_1, window_bounds = array<i64: 1, 256>}, {transform_indices = @transform_2, window_bounds = array<i64: 128, 256>}]} {
    %c0 = arith.constant 0 : index
    %c0_0 = arith.constant 0 : index
    %0 = vector.load %arg1[%c0, %c0_0] : memref<128x256xbf16, #tpu.memory_space<vmem>>, vector<128x256xbf16>
    %1 = arith.extf %0 : vector<128x256xbf16> to vector<128x256xf32>
    %2 = arith.mulf %1, %1 : vector<128x256xf32>
    %cst = arith.constant dense<0.000000e+00> : vector<128xf32>
    %3 = vector.multi_reduction <add>, %2, %cst [1] : vector<128x256xf32> to vector<128xf32>
    %4 = vector.shape_cast %3 : vector<128xf32> to vector<128x1xf32>
    %cst_1 = arith.constant 2.560000e+02 : f32
    %5 = vector.broadcast %cst_1 : f32 to vector<128x1xf32>
    %6 = arith.divf %4, %5 : vector<128x1xf32>
    %cst_2 = arith.constant 9.99999997E-7 : f32
    %7 = vector.broadcast %cst_2 : f32 to vector<128x1xf32>
    %8 = arith.addf %6, %7 : vector<128x1xf32>
    %9 = math.rsqrt %8 : vector<128x1xf32>
    %10 = vector.broadcast %9 : vector<128x1xf32> to vector<128x256xf32>
    %11 = arith.mulf %1, %10 : vector<128x256xf32>
    %c0_3 = arith.constant 0 : index
    %c0_4 = arith.constant 0 : index
    %12 = vector.load %arg2[%c0_3, %c0_4] : memref<1x256xf32, #tpu.memory_space<vmem>>, vector<1x256xf32>
    %13 = vector.broadcast %12 : vector<1x256xf32> to vector<128x256xf32>
    %14 = arith.mulf %11, %13 : vector<128x256xf32>
    %15 = arith.truncf %14 : vector<128x256xf32> to vector<128x256xbf16>
    %c0_5 = arith.constant 0 : index
    %c0_6 = arith.constant 0 : index
    %16 = vector.load %arg3[%c0_5, %c0_6] : memref<128x256xbf16, #tpu.memory_space<vmem>>, vector<128x256xbf16>
    tpu.vector_store %arg3[%c0_5, %c0_6], %15 {strides = array<i32>} : memref<128x256xbf16, #tpu.memory_space<vmem>>, vector<128x256xbf16>,
    return
  }
  func.func @transform_0(%arg0: i32) -> (i32, i32) {
    %c0_i32 = arith.constant 0 : i32
    %c0_i32_0 = arith.constant 0 : i32
    return %arg0, %c0_i32 : i32, i32
  }
  func.func @transform_1(%arg0: i32) -> (i32, i32) {
    %c0_i32 = arith.constant 0 : i32
    %c0_i32_0 = arith.constant 0 : i32
    %c0_i32_1 = arith.constant 0 : i32
    return %c0_i32, %c0_i32_0 : i32, i32
  }
  func.func @transform_2(%arg0: i32) -> (i32, i32) {
    %c0_i32 = arith.constant 0 : i32
    %c0_i32_0 = arith.constant 0 : i32
    return %arg0, %c0_i32 : i32, i32
  }
}

</mosaic_0001>

<bundles_post_ra>
// kernel: tpu_custom_call.1
= control target key start
LH: loop header
LB: loop body
LE: loop exit
PB: predicated region body
PF: predicated region fallthrough
CT: control target
= control target key end

     0   :  { %7 = vsyncpa [#allocation3], 0  ;;  %s787_s0 = inlined_call_operand.hbm [shape: bf16[128,256], index: 0, kind: input, shape index: {}]   ;;  %s788_s1 = inlined_call_operand.hbm [shape: f32[1,256], index: 1, kind: input, shape index: {}]   ;;  %s789_s2 = inlined_call_operand.hbm [shape: bf16[128,256], index: 2, kind: output, shape index: {}]  }
   0x1   :  { %8 = vsyncpa [#allocation6], 0 }
   0x2   :  { %9 = vsyncpa [#allocation4], 0  ;;  %s556_s9 = smov [#allocation2]  }
   0x3   :  { %s15_s10 = sshll.u32 %s556_s9, 4  ;;  %s16_s10 = int_to_ptr.vmem [resolvable:$true] %s15_s10 }
   0x4   :  { %s498_s11 = scalar_lea.vmem %s16_s10, 2048  ;;  %p503_p1 = scmp.lt.s32.totalorder %s16_s10, %s16_s10 }
   0x5   :  { %p499_p0 = scmp.ne.s32.totalorder %s16_s10, %s498_s11  ;;  %p504_p2 = scmp.lt.s32.totalorder %s498_s11, %s498_s11 }
   0x7   :  { %p505_p3 = por %p504_p2, %p503_p1 }
   0x9   :  { %p506_p4 = pnand %p505_p3, %p499_p0 }
   0xb   :  { %509 = shalt.err (!%p506_p4)
}
   0xc   :  { %s557_s12 = smov 128   ;;  %s558_s13 = smov 8  }
   0xd   :  { %21 = dma.hbm_to_vmem [thread:$0]  %s787_s0, 2048, %s16_s10, [#allocation3], %s557_s12, %s557_s12, %s558_s13  }
   0xe   :  { %s559_s16 = smov [#allocation5]  }
   0xf   :  { %s28_s17 = sshll.u32 %s559_s16, 4  ;;  %s29_s17 = int_to_ptr.vmem [resolvable:$true] %s28_s17 }
  0x10   :  { %s518_s18 = scalar_lea.vmem %s29_s17, 32  ;;  %p523_p6 = scmp.lt.s32.totalorder %s29_s17, %s29_s17 }
  0x11   :  { %p519_p5 = scmp.ne.s32.totalorder %s29_s17, %s518_s18  ;;  %p524_p7 = scmp.lt.s32.totalorder %s518_s18, %s518_s18 }
  0x13   :  { %p525_p8 = por %p524_p7, %p523_p6 }
  0x15   :  { %p526_p9 = pnand %p525_p8, %p519_p5 }
  0x17   :  { %529 = shalt.err (!%p526_p9)
}
  0x18   :  { %31 = dma.hbm_to_vmem [thread:$0]  %s788_s1, 32, %s29_s17, [#allocation6]  }
  0x19   :  { %550 = dma.done.wait [#allocation3], 2048  }
  0x1a   :  { %551 = vsyncadd [#allocation3], 4294965248 }
  0x1b   :  { %552 = dma.done.wait [#allocation6], 32  }
  0x1c   :  { %553 = vsyncadd [#allocation6], 4294967264  ;;  %v40_v0 = vld [vmem:[#allocation2 + $0x10] sm:$0xff]  ;;  %v38_v1 = vld [vmem:[#allocation2] sm:$0xff]  ;;  %s560_s0 = smov [#allocation7]  }
  0x1d   :  { %v41_v2 = vld [vmem:[#allocation2 + $0x18] sm:$0xff]  ;;  %v585_v3 = vunpack.c.l.bf16 %v40_v0  ;;  %v587_v4 = vunpack.c.h.bf16 %v40_v0  ;;  %v589_v5 = vunpack.c.l.bf16 %v38_v1  ;;  %v591_v6 = vunpack.c.h.bf16 %v38_v1  ;;  %v39_v7 = vld [vmem:[#allocation2 + $0x8] sm:$0xff]  ;;  %v42_v17 = vld [vmem:[#allocation2 + $0x20] sm:$0xff]  ;;  %s408_s1 = sshll.u32 %s560_s0, 4  ;;  %s409_s1 = int_to_ptr.vmem [resolvable:$true] %s408_s1 }
  0x1e   :  { %v593_v8 = vunpack.c.l.bf16 %v41_v2  ;;  %v595_v9 = vunpack.c.h.bf16 %v41_v2  ;;  %v597_v10 = vunpack.c.l.bf16 %v39_v7  ;;  %v599_v11 = vunpack.c.h.bf16 %v39_v7  ;;  %v43_v12 = vld [vmem:[#allocation2 + $0x28] sm:$0xff]  ;;  %v45_v22 = vld [vmem:[#allocation2 + $0x38] sm:$0xff]  ;;  %v44_v27 = vld [vmem:[#allocation2 + $0x30] sm:$0xff]  ;;  %s530_s21 = scalar_lea.vmem %s409_s1, 2048  ;;  %p535_p11 = scmp.lt.s32.totalorder %s409_s1, %s409_s1 }
  0x1f   :  { %v90_v13 = vmul.f32 %v585_v3, %v585_v3  ;;  %v91_v14 = vmul.f32 %v587_v4, %v587_v4  ;;  %v86_v15 = vmul.f32 %v589_v5, %v589_v5  ;;  %v87_v16 = vmul.f32 %v591_v6, %v591_v6  ;;  %v47_v36 = vld [vmem:[#allocation2 + $0x48] sm:$0xff]  ;;  %v46_v41 = vld [vmem:[#allocation2 + $0x40] sm:$0xff]  ;;  %v49_v48 = vld [vmem:[#allocation2 + $0x58] sm:$0xff]  ;;  %p531_p10 = scmp.ne.s32.totalorder %s409_s1, %s530_s21  ;;  %p536_p12 = scmp.lt.s32.totalorder %s530_s21, %s530_s21 }
  0x20   :  { %v92_v18 = vmul.f32 %v593_v8, %v593_v8  ;;  %v93_v19 = vmul.f32 %v595_v9, %v595_v9  ;;  %v88_v20 = vmul.f32 %v597_v10, %v597_v10  ;;  %v89_v21 = vmul.f32 %v599_v11, %v599_v11  ;;  %v48_v53 = vld [vmem:[#allocation2 + $0x50] sm:$0xff]  ;;  %v51_v61 = vld [vmem:[#allocation2 + $0x68] sm:$0xff]  ;;  %v50_v1 = vld [vmem:[#allocation2 + $0x60] sm:$0xff] }
  0x21   :  { %v124_v23 = vadd.f32 %v91_v14, %v90_v13  ;;  %v118_v24 = vadd.f32 %v87_v16, %v86_v15  ;;  %v617_v25 = vunpack.c.l.bf16 %v43_v12  ;;  %v619_v26 = vunpack.c.h.bf16 %v43_v12  ;;  %p537_p13 = por %p536_p12, %p535_p11 }
  0x22   :  { %v127_v28 = vadd.f32 %v93_v19, %v92_v18  ;;  %v121_v29 = vadd.f32 %v89_v21, %v88_v20  ;;  %v621_v30 = vunpack.c.l.bf16 %v42_v17  ;;  %v623_v31 = vunpack.c.h.bf16 %v42_v17  ;;  %v53_v20 = vld [vmem:[#allocation2 + $0x78] sm:$0xff]  ;;  %v52_v21 = vld [vmem:[#allocation2 + $0x70] sm:$0xff] }
  0x23   :  { %125 = vadd.xlane.f32.xlu1 %v124_v23  ;;  %119 = vadd.xlane.f32.xlu0 %v118_v24  ;;  %v96_v32 = vmul.f32 %v617_v25, %v617_v25  ;;  %v97_v33 = vmul.f32 %v619_v26, %v619_v26  ;;  %v629_v34 = vunpack.c.l.bf16 %v45_v22  ;;  %v631_v35 = vunpack.c.h.bf16 %v45_v22  ;;  %p538_p0 = pnand %p537_p13, %p531_p10 }
  0x24   :  { %v94_v37 = vmul.f32 %v621_v30, %v621_v30  ;;  %v95_v38 = vmul.f32 %v623_v31, %v623_v31  ;;  %v637_v39 = vunpack.c.l.bf16 %v44_v27  ;;  %v639_v40 = vunpack.c.h.bf16 %v44_v27 }
  0x25   :  { %v100_v42 = vmul.f32 %v629_v34, %v629_v34  ;;  %v101_v43 = vmul.f32 %v631_v35, %v631_v35  ;;  %v133_v44 = vadd.f32 %v97_v33, %v96_v32  ;;  %v649_v47 = vunpack.c.l.bf16 %v47_v36 }
  0x26   :  { %v98_v45 = vmul.f32 %v637_v39, %v637_v39  ;;  %v99_v46 = vmul.f32 %v639_v40, %v639_v40  ;;  %v130_v49 = vadd.f32 %v95_v38, %v94_v37  ;;  %v651_v50 = vunpack.c.h.bf16 %v47_v36 }
  0x27   :  { %128 = vadd.xlane.f32.xlu1 %v127_v28  ;;  %122 = vadd.xlane.f32.xlu0 %v121_v29  ;;  %v653_v51 = vunpack.c.l.bf16 %v46_v41  ;;  %v655_v52 = vunpack.c.h.bf16 %v46_v41  ;;  %v139_v54 = vadd.f32 %v101_v43, %v100_v42  ;;  %v657_v55 = vunpack.c.l.bf16 %v49_v48 }
  0x28   :  { %v659_v56 = vunpack.c.h.bf16 %v49_v48  ;;  %v136_v57 = vadd.f32 %v99_v46, %v98_v45  ;;  %v104_v58 = vmul.f32 %v649_v47, %v649_v47  ;;  %v663_v59 = vunpack.c.l.bf16 %v48_v53 }
  0x29   :  { %v665_v60 = vunpack.c.h.bf16 %v48_v53  ;;  %v105_v62 = vmul.f32 %v651_v50, %v651_v50  ;;  %v102_v63 = vmul.f32 %v653_v51, %v653_v51  ;;  %v103_v0 = vmul.f32 %v655_v52, %v655_v52 }
  0x2a   :  { %v108_v2 = vmul.f32 %v657_v55, %v657_v55  ;;  %v109_v7 = vmul.f32 %v659_v56, %v659_v56  ;;  %v677_v12 = vunpack.c.l.bf16 %v51_v61  ;;  %v106_v13 = vmul.f32 %v663_v59, %v663_v59 }
  0x2b   :  { %134 = vadd.xlane.f32.xlu1 %v133_v44  ;;  %131 = vadd.xlane.f32.xlu0 %v130_v49  ;;  %v107_v14 = vmul.f32 %v665_v60, %v665_v60  ;;  %v683_v15 = vunpack.c.h.bf16 %v51_v61  ;;  %v145_v16 = vadd.f32 %v105_v62, %v104_v58  ;;  %v142_v17 = vadd.f32 %v103_v0, %v102_v63 }
  0x2c   :  { %v685_v18 = vunpack.c.l.bf16 %v50_v1  ;;  %v687_v19 = vunpack.c.h.bf16 %v50_v1  ;;  %v151_v22 = vadd.f32 %v109_v7, %v108_v2  ;;  %v112_v23 = vmul.f32 %v677_v12, %v677_v12 }
  0x2d   :  { %v148_v24 = vadd.f32 %v107_v14, %v106_v13  ;;  %v113_v27 = vmul.f32 %v683_v15, %v683_v15  ;;  %v693_v28 = vunpack.c.l.bf16 %v53_v20  ;;  %v695_v29 = vunpack.c.h.bf16 %v53_v20 }
  0x2e   :  { %v110_v32 = vmul.f32 %v685_v18, %v685_v18  ;;  %v111_v33 = vmul.f32 %v687_v19, %v687_v19  ;;  %v701_v36 = vunpack.c.l.bf16 %v52_v21  ;;  %v703_v37 = vunpack.c.h.bf16 %v52_v21 }
  0x2f   :  { %140 = vadd.xlane.f32.xlu1 %v139_v54  ;;  %137 = vadd.xlane.f32.xlu0 %v136_v57  ;;  %v157_v38 = vadd.f32 %v113_v27, %v112_v23  ;;  %v116_v41 = vmul.f32 %v693_v28, %v693_v28  ;;  %v117_v42 = vmul.f32 %v695_v29, %v695_v29  ;;  %v249_v62 = vlaneseq }
  0x30   :  { %v154_v43 = vadd.f32 %v111_v33, %v110_v32  ;;  %v114_v44 = vmul.f32 %v701_v36, %v701_v36  ;;  %v115_v45 = vmul.f32 %v703_v37, %v703_v37  ;;  %v247_v33 = vld [vmem:[#allocation5] sm:$0x3] }
  0x31   :  { %v163_v46 = vadd.f32 %v117_v42, %v116_v41  ;;  %v250_v14 = vshrl.u32 %v249_v62, 7 }
  0x32   :  { %v160_v48 = vadd.f32 %v115_v45, %v114_v44 }
  0x33   :  { %146 = vadd.xlane.f32.xlu1 %v145_v16  ;;  %143 = vadd.xlane.f32.xlu0 %v142_v17 }
  0x37   :  { %152 = vadd.xlane.f32.xlu1 %v151_v22  ;;  %149 = vadd.xlane.f32.xlu0 %v148_v24  ;;  %v251_v24 = vsub.s32 0, %v250_v14 }
  0x39   :  { %v713_v45 = vrot.slane %v247_v33, %v251_v24 }
  0x3b   :  { %158 = vadd.xlane.f32.xlu1 %v157_v38  ;;  %155 = vadd.xlane.f32.xlu0 %v154_v43  ;;  %v255_v38 = vsub.s32 1, %v250_v14 }
  0x3f   :  { %164 = vadd.xlane.f32.xlu1 %v163_v46  ;;  %161 = vadd.xlane.f32.xlu0 %v160_v48 }
  0xac   :  { %v126_v49 = vpop.xlane.xlu1 %125  ;;  %v120_v53 = vpop.xlane.xlu0 %119 }
  0xad   :  { %v169_v54 = vmul.f32 0.00390625, %v126_v49  ;;  %v167_v57 = vmul.f32 0.00390625, %v120_v53  ;;  %v715_v49 = vrot.slane %v247_v33, %v255_v38 }
  0xaf   :  { %v185_v58 = vadd.f32 1e-06, %v169_v54  ;;  %v183_v61 = vadd.f32 1e-06, %v167_v57 }
  0xb0   :  { %v129_v63 = vpop.xlane.xlu1 %128  ;;  %v123_v0 = vpop.xlane.xlu0 %122 }
  0xb1   :  { %458 = vrsqrt.f32 %v185_v58  ;;  %v170_v1 = vmul.f32 0.00390625, %v129_v63  ;;  %v168_v2 = vmul.f32 0.00390625, %v123_v0 }
  0xb2   :  { %460 = vrsqrt.f32 %v183_v61 }
  0xb3   :  { %v186_v7 = vadd.f32 1e-06, %v170_v1  ;;  %v184_v13 = vadd.f32 1e-06, %v168_v2 }
  0xb4   :  { %v135_v16 = vpop.xlane.xlu1 %134  ;;  %v132_v17 = vpop.xlane.xlu0 %131 }
  0xb5   :  { %462 = vrsqrt.f32 %v186_v7  ;;  %v172_v20 = vmul.f32 0.00390625, %v135_v16  ;;  %v171_v21 = vmul.f32 0.00390625, %v132_v17 }
  0xb6   :  { %464 = vrsqrt.f32 %v184_v13 }
  0xb7   :  { %v188_v22 = vadd.f32 1e-06, %v172_v20  ;;  %v187_v23 = vadd.f32 1e-06, %v171_v21 }
  0xb8   :  { %v141_v27 = vpop.xlane.xlu1 %140  ;;  %v138_v32 = vpop.xlane.xlu0 %137 }
  0xb9   :  { %466 = vrsqrt.f32 %v188_v22  ;;  %v174_v41 = vmul.f32 0.00390625, %v141_v27  ;;  %v173_v42 = vmul.f32 0.00390625, %v138_v32 }
  0xba   :  { %468 = vrsqrt.f32 %v187_v23 }
  0xbb   :  { %v190_v43 = vadd.f32 1e-06, %v174_v41  ;;  %v189_v44 = vadd.f32 1e-06, %v173_v42 }
  0xbc   :  { %v147_v46 = vpop.xlane.xlu1 %146  ;;  %v144_v48 = vpop.xlane.xlu0 %143 }
  0xbd   :  { %470 = vrsqrt.f32 %v190_v43  ;;  %v176_v53 = vmul.f32 0.00390625, %v147_v46  ;;  %v175_v54 = vmul.f32 0.00390625, %v144_v48 }
  0xbe   :  { %v459_v57 = vpop.eup %458  ;;  %472 = vrsqrt.f32 %v189_v44 }
  0xbf   :  { %v461_v58 = vpop.eup %460  ;;  %v219_v61 = vmul.f32 %v459_v57, %v585_v3  ;;  %v220_v62 = vmul.f32 %v459_v57, %v587_v4  ;;  %v192_v63 = vadd.f32 1e-06, %v176_v53  ;;  %v191_v0 = vadd.f32 1e-06, %v175_v54 }
  0xc0   :  { %v215_v1 = vmul.f32 %v461_v58, %v589_v5  ;;  %v216_v2 = vmul.f32 %v461_v58, %v591_v6  ;;  %v153_v7 = vpop.xlane.xlu1 %152  ;;  %v150_v13 = vpop.xlane.xlu0 %149 }
  0xc1   :  { %v263_v14 = vmul.f32 %v713_v45, %v219_v61  ;;  %v264_v16 = vmul.f32 %v715_v49, %v220_v62  ;;  %474 = vrsqrt.f32 %v192_v63  ;;  %v178_v17 = vmul.f32 0.00390625, %v153_v7 }
  0xc2   :  { %v463_v20 = vpop.eup %462  ;;  %v259_v21 = vmul.f32 %v713_v45, %v215_v1  ;;  %v260_v3 = vmul.f32 %v715_v49, %v216_v2  ;;  %476 = vrsqrt.f32 %v191_v0  ;;  %v177_v4 = vmul.f32 0.00390625, %v150_v13 }
  0xc3   :  { %v465_v22 = vpop.eup %464  ;;  %v439_v23 = vpack.c.bf16 %v264_v16, %v263_v14  ;;  %v221_v5 = vmul.f32 %v463_v20, %v593_v8  ;;  %v222_v6 = vmul.f32 %v463_v20, %v595_v9  ;;  %v194_v24 = vadd.f32 1e-06, %v178_v17 }
  0xc4   :  { %v437_v27 = vpack.c.bf16 %v260_v3, %v259_v21  ;;  %v217_v32 = vmul.f32 %v465_v22, %v597_v10  ;;  %v218_v33 = vmul.f32 %v465_v22, %v599_v11  ;;  %v193_v38 = vadd.f32 1e-06, %v177_v4  ;;  %v159_v41 = vpop.xlane.xlu1 %158  ;;  %v156_v42 = vpop.xlane.xlu0 %155 }
  0xc5   :  { %389 = vst [vmem:[#allocation7 + $0x10] sm:$0xff] %v439_v23  ;;  %v265_v43 = vmul.f32 %v713_v45, %v221_v5  ;;  %v266_v44 = vmul.f32 %v715_v49, %v222_v6  ;;  %478 = vrsqrt.f32 %v194_v24  ;;  %v180_v46 = vmul.f32 0.00390625, %v159_v41 }
  0xc6   :  { %v467_v48 = vpop.eup %466  ;;  %387 = vst [vmem:[#allocation7] sm:$0xff] %v437_v27  ;;  %v261_v8 = vmul.f32 %v713_v45, %v217_v32  ;;  %v262_v9 = vmul.f32 %v715_v49, %v218_v33  ;;  %480 = vrsqrt.f32 %v193_v38  ;;  %v179_v10 = vmul.f32 0.00390625, %v156_v42 }
  0xc7   :  { %v469_v53 = vpop.eup %468  ;;  %v440_v11 = vpack.c.bf16 %v266_v44, %v265_v43  ;;  %v225_v54 = vmul.f32 %v467_v48, %v617_v25  ;;  %v226_v57 = vmul.f32 %v467_v48, %v619_v26  ;;  %v196_v58 = vadd.f32 1e-06, %v180_v46 }
  0xc8   :  { %v438_v61 = vpack.c.bf16 %v262_v9, %v261_v8  ;;  %v223_v62 = vmul.f32 %v469_v53, %v621_v30  ;;  %v224_v63 = vmul.f32 %v469_v53, %v623_v31  ;;  %v195_v0 = vadd.f32 1e-06, %v179_v10  ;;  %v165_v1 = vpop.xlane.xlu1 %164  ;;  %v162_v2 = vpop.xlane.xlu0 %161 }
  0xc9   :  { %390 = vst [vmem:[#allocation7 + $0x18] sm:$0xff] %v440_v11  ;;  %v269_v7 = vmul.f32 %v713_v45, %v225_v54  ;;  %v270_v13 = vmul.f32 %v715_v49, %v226_v57  ;;  %482 = vrsqrt.f32 %v196_v58  ;;  %v182_v14 = vmul.f32 0.00390625, %v165_v1 }
  0xca   :  { %v471_v16 = vpop.eup %470  ;;  %388 = vst [vmem:[#allocation7 + $0x8] sm:$0xff] %v438_v61  ;;  %v267_v25 = vmul.f32 %v713_v45, %v223_v62  ;;  %v268_v26 = vmul.f32 %v715_v49, %v224_v63  ;;  %484 = vrsqrt.f32 %v195_v0  ;;  %v181_v30 = vmul.f32 0.00390625, %v162_v2 }
  0xcb   :  { %v473_v17 = vpop.eup %472  ;;  %v442_v31 = vpack.c.bf16 %v270_v13, %v269_v7  ;;  %v229_v20 = vmul.f32 %v471_v16, %v629_v34  ;;  %v230_v21 = vmul.f32 %v471_v16, %v631_v35  ;;  %v198_v3 = vadd.f32 1e-06, %v182_v14 }
  0xcc   :  { %v441_v4 = vpack.c.bf16 %v268_v26, %v267_v25  ;;  %v227_v22 = vmul.f32 %v473_v17, %v637_v39  ;;  %v228_v23 = vmul.f32 %v473_v17, %v639_v40  ;;  %v197_v5 = vadd.f32 1e-06, %v181_v30 }
  0xcd   :  { %392 = vst [vmem:[#allocation7 + $0x28] sm:$0xff] %v442_v31  ;;  %v273_v6 = vmul.f32 %v713_v45, %v229_v20  ;;  %v274_v24 = vmul.f32 %v715_v49, %v230_v21  ;;  %486 = vrsqrt.f32 %v198_v3 }
  0xce   :  { %v475_v27 = vpop.eup %474  ;;  %391 = vst [vmem:[#allocation7 + $0x20] sm:$0xff] %v441_v4  ;;  %v271_v32 = vmul.f32 %v713_v45, %v227_v22  ;;  %v272_v34 = vmul.f32 %v715_v49, %v228_v23  ;;  %488 = vrsqrt.f32 %v197_v5 }
  0xcf   :  { %v477_v35 = vpop.eup %476  ;;  %v444_v33 = vpack.c.bf16 %v274_v24, %v273_v6  ;;  %v233_v39 = vmul.f32 %v475_v27, %v649_v47  ;;  %v234_v40 = vmul.f32 %v475_v27, %v651_v50 }
  0xd0   :  { %v443_v38 = vpack.c.bf16 %v272_v34, %v271_v32  ;;  %v231_v41 = vmul.f32 %v477_v35, %v653_v51  ;;  %v232_v42 = vmul.f32 %v477_v35, %v655_v52 }
  0xd1   :  { %394 = vst [vmem:[#allocation7 + $0x38] sm:$0xff] %v444_v33  ;;  %v277_v43 = vmul.f32 %v713_v45, %v233_v39  ;;  %v278_v44 = vmul.f32 %v715_v49, %v234_v40 }
  0xd2   :  { %v479_v46 = vpop.eup %478  ;;  %393 = vst [vmem:[#allocation7 + $0x30] sm:$0xff] %v443_v38  ;;  %v275_v48 = vmul.f32 %v713_v45, %v231_v41  ;;  %v276_v8 = vmul.f32 %v715_v49, %v232_v42 }
  0xd3   :  { %v481_v9 = vpop.eup %480  ;;  %v446_v47 = vpack.c.bf16 %v278_v44, %v277_v43  ;;  %v237_v50 = vmul.f32 %v479_v46, %v657_v55  ;;  %v238_v10 = vmul.f32 %v479_v46, %v659_v56 }
  0xd4   :  { %v445_v51 = vpack.c.bf16 %v276_v8, %v275_v48  ;;  %v235_v52 = vmul.f32 %v481_v9, %v663_v59  ;;  %v236_v53 = vmul.f32 %v481_v9, %v665_v60 }
  0xd5   :  { %396 = vst [vmem:[#allocation7 + $0x48] sm:$0xff] %v446_v47  ;;  %v281_v11 = vmul.f32 %v713_v45, %v237_v50  ;;  %v282_v54 = vmul.f32 %v715_v49, %v238_v10 }
  0xd6   :  { %v483_v57 = vpop.eup %482  ;;  %395 = vst [vmem:[#allocation7 + $0x40] sm:$0xff] %v445_v51  ;;  %v279_v58 = vmul.f32 %v713_v45, %v235_v52  ;;  %v280_v61 = vmul.f32 %v715_v49, %v236_v53 }
  0xd7   :  { %v485_v62 = vpop.eup %484  ;;  %v448_v55 = vpack.c.bf16 %v282_v54, %v281_v11  ;;  %v241_v56 = vmul.f32 %v483_v57, %v677_v12  ;;  %v242_v63 = vmul.f32 %v483_v57, %v683_v15 }
  0xd8   :  { %v447_v59 = vpack.c.bf16 %v280_v61, %v279_v58  ;;  %v239_v60 = vmul.f32 %v485_v62, %v685_v18  ;;  %v240_v0 = vmul.f32 %v485_v62, %v687_v19 }
  0xd9   :  { %398 = vst [vmem:[#allocation7 + $0x58] sm:$0xff] %v448_v55  ;;  %v285_v1 = vmul.f32 %v713_v45, %v241_v56  ;;  %v286_v2 = vmul.f32 %v715_v49, %v242_v63 }
  0xda   :  { %v487_v7 = vpop.eup %486  ;;  %397 = vst [vmem:[#allocation7 + $0x50] sm:$0xff] %v447_v59  ;;  %v283_v13 = vmul.f32 %v713_v45, %v239_v60  ;;  %v284_v14 = vmul.f32 %v715_v49, %v240_v0 }
  0xdb   :  { %v489_v16 = vpop.eup %488  ;;  %v450_v12 = vpack.c.bf16 %v286_v2, %v285_v1  ;;  %v245_v15 = vmul.f32 %v487_v7, %v693_v28  ;;  %v246_v25 = vmul.f32 %v487_v7, %v695_v29 }
  0xdc   :  { %v449_v18 = vpack.c.bf16 %v284_v14, %v283_v13  ;;  %v243_v19 = vmul.f32 %v489_v16, %v701_v36  ;;  %v244_v26 = vmul.f32 %v489_v16, %v703_v37 }
  0xdd   :  { %400 = vst [vmem:[#allocation7 + $0x68] sm:$0xff] %v450_v12  ;;  %v289_v30 = vmul.f32 %v713_v45, %v245_v15  ;;  %v290_v17 = vmul.f32 %v715_v49, %v246_v25 }
  0xde   :  { %399 = vst [vmem:[#allocation7 + $0x60] sm:$0xff] %v449_v18  ;;  %v287_v31 = vmul.f32 %v713_v45, %v243_v19  ;;  %v288_v20 = vmul.f32 %v715_v49, %v244_v26 }
  0xdf   :  { %v452_v28 = vpack.c.bf16 %v290_v17, %v289_v30 }
  0xe0   :  { %v451_v21 = vpack.c.bf16 %v288_v20, %v287_v31 }
  0xe1   :  { %402 = vst [vmem:[#allocation7 + $0x78] sm:$0xff] %v452_v28 }
  0xe2   :  { %401 = vst [vmem:[#allocation7 + $0x70] sm:$0xff] %v451_v21 }
  0xe3   :  { %541 = shalt.err (!%p538_p0)
}
  0xe4   :  { %414 = dma.vmem_to_hbm [thread:$0]  %s409_s1, 2048, %s789_s2, [#allocation4], %s557_s12, %s557_s12, %s558_s13  }
  0xe5   :  { %554 = dma.done.wait [#allocation4], 2048  }
  0xe6   :  { %555 = vsyncadd [#allocation4], 4294965248 }
  0xe7   :  { %418 = vsyncpa [#allocation3], 1 }
  0xe8   :  { %419 = vsyncpa [#allocation6], 1 }
  0xe9   :  { %420 = vsyncpa [#allocation4], 1 }

</bundles_post_ra>
